<compile_context>
chip_gen: v7x
topology: tpu7x:2x2x1
jax: 0.10.0
libtpu: 0.0.40
codegen_flags: <defaults>
</compile_context>

<pallas_src>
import functools

import jax
import jax.numpy as jnp
from jax import lax
from jax.experimental import pallas as pl
from jax.experimental.pallas import tpu as pltpu


def _shift_error_kernel(x_ref, o_ref, *, topk, n_rows, tm, tiles_per_core):
    c = pl.program_id(0)          # core-split index ("parallel")
    i = pl.program_id(1)          # row-tile index within this core ("arbitrary")

    @pl.when(i == 0)
    def _():
        o_ref[...] = jnp.zeros_like(o_ref)

    x = x_ref[...].astype(jnp.float32)          # (tm, N)
    n = x.shape[-1]

    # Sum of top-k values per row via iterative max extraction (topk is small
    # and static).  Duplicates handled like torch.topk: exactly one occurrence
    # of the current max (the first) is removed per step.
    col = lax.broadcasted_iota(jnp.int32, x.shape, 1) if topk > 1 else None
    total = jnp.zeros((tm, 1), jnp.float32)
    for j in range(topk):
        m = jnp.max(x, axis=-1, keepdims=True)              # (tm, 1)
        total = total + m
        if j + 1 < topk:                                    # last step: max only
            is_max = x == m
            first = jnp.min(jnp.where(is_max, col, n), axis=-1, keepdims=True)
            x = jnp.where(col == first, -jnp.inf, x)

    err = (1.0 - total) ** 2                                 # (tm, 1)

    # Mask padding rows of the ragged last tile (and clamped duplicate tiles).
    # Keep this a select (not a multiply): garbage rows may hold NaN/Inf.
    t = c * tiles_per_core + i                               # logical row-tile id
    row_ids = t * tm + lax.broadcasted_iota(jnp.int32, (tm, 1), 0)
    err = jnp.where(row_ids < n_rows, err, 0.0)

    o_ref[...] = o_ref[...] + jnp.sum(err)


def _choose_tm(rows, n):
    """Largest row tile (multiple of 8) whose f32 working copy is ~2 MiB."""
    budget_elems = (2 * 1024 * 1024) // 4           # 2 MiB of f32 per tile
    tm = (budget_elems // max(n, 1)) // 8 * 8
    tm = max(8, min(1024, tm))
    rows_up = pl.cdiv(rows, 8) * 8
    return min(tm, max(8, rows_up))


def shift_error(x, *, topk, step=None, tm=None, core_splits=2):
    """Pallas implementation of shiftError.forward (step is unused, as in torch)."""
    del step  # unused by the reference forward pass
    x2 = x.reshape(-1, x.shape[-1])                  # keep original dtype in HBM
    rows, n = x2.shape
    if tm is None:
        tm = _choose_tm(rows, n)
    num_tiles = pl.cdiv(rows, tm)
    g = core_splits if num_tiles >= 2 else 1         # dual-TC split on v7x
    tiles_per_core = pl.cdiv(num_tiles, g)

    def in_index_map(c, i):
        t = c * tiles_per_core + i
        if g * tiles_per_core != num_tiles:          # clamp only when grid is padded
            t = jnp.minimum(t, num_tiles - 1)
        return (t, 0)

    kernel = functools.partial(
        _shift_error_kernel,
        topk=topk, n_rows=rows, tm=tm, tiles_per_core=tiles_per_core)

    partial = pl.pallas_call(
        kernel,
        out_shape=jax.ShapeDtypeStruct((g, 1, 1), jnp.float32),
        grid_spec=pltpu.PrefetchScalarGridSpec(
            num_scalar_prefetch=0,
            grid=(g, tiles_per_core),
            in_specs=[pl.BlockSpec((tm, n), in_index_map)],
            out_specs=pl.BlockSpec((1, 1, 1), lambda c, i: (c, 0, 0)),
        ),
        compiler_params=pltpu.CompilerParams(
            dimension_semantics=("parallel", "arbitrary"),
            vmem_limit_bytes=32 * 1024 * 1024,
        ),
    )(x2)
    return jnp.sum(partial) / jnp.float32(rows)


def _reference(x, topk):
    vals, _ = lax.top_k(x.astype(jnp.float32), topk)
    return jnp.mean((1.0 - jnp.sum(vals, axis=-1)) ** 2)


if __name__ == "__main__":
    key = jax.random.PRNGKey(0)
    step, topk = 1, 3  # module __init__ args (step is unused in forward)

    # Small shape consistent with the module: (batch=2, seq=8, features=32).
    x = jax.random.normal(key, (2, 8, 32), dtype=jnp.float32)
    loss = jax.block_until_ready(shift_error(x, topk=topk, step=step))
    ref = _reference(x, topk)
    assert jnp.allclose(loss, ref, rtol=1e-4, atol=1e-5), (loss, ref)

    # Multi-tile path with both grid axes active (forced small tm).
    loss2 = jax.block_until_ready(shift_error(x, topk=topk, step=step, tm=8))
    assert jnp.allclose(loss2, ref, rtol=1e-4, atol=1e-5), (loss2, ref)

    # Ragged / odd-tile-count path (exercises clamped duplicate tile + row mask).
    x3 = jax.random.normal(jax.random.PRNGKey(0), (25, 100, 32), dtype=jnp.float32)
    loss3 = jax.block_until_ready(shift_error(x3, topk=topk, step=step))
    ref3 = _reference(x3, topk)
    assert jnp.allclose(loss3, ref3, rtol=1e-4, atol=1e-5), (loss3, ref3)

    print("KERNEL_OK")
</pallas_src>

<mosaic_0001>
module attributes {stable_mosaic.version = 11 : i64} {
  func.func @_shift_error_kernel(%arg0: i32, %arg1: i32, %arg2: memref<16x32xf32, #tpu.memory_space<vmem>>, %arg3: memref<1x1x1xf32, #tpu.memory_space<vmem>>) attributes {dimension_semantics = [#tpu.dimension_semantics<parallel>, #tpu.dimension_semantics<arbitrary>], iteration_bounds = array<i64: 1, 1>, scalar_prefetch = 0 : i64, scratch_operands = 0 : i64, tpu.core_type = #tpu.core_type<tc>, window_params = [{transform_indices = @transform_0, window_bounds = array<i64: 16, 32>}, {transform_indices = @transform_1, window_bounds = array<i64: 1, 1, 1>}]} {
    %c0_i32 = arith.constant 0 : i32
    %0 = arith.cmpi eq, %arg1, %c0_i32 : i32
    %1 = arith.extui %0 : i1 to i32
    %c0_i32_0 = arith.constant 0 : i32
    %2 = arith.cmpi ne, %1, %c0_i32_0 : i32
    scf.if %2 {
      %cst_20 = arith.constant 0.000000e+00 : f32
      %56 = vector.broadcast %cst_20 : f32 to vector<1x1x1xf32>
      %c0_21 = arith.constant 0 : index
      %c0_22 = arith.constant 0 : index
      %c0_23 = arith.constant 0 : index
      %57 = vector.load %arg3[%c0_21, %c0_22, %c0_23] : memref<1x1x1xf32, #tpu.memory_space<vmem>>, vector<1x1x1xf32>
      tpu.vector_store %arg3[%c0_21, %c0_22, %c0_23], %56 {strides = array<i32>} : memref<1x1x1xf32, #tpu.memory_space<vmem>>, vector<1x1x1xf32>,
    } else {
    }
    %c0 = arith.constant 0 : index
    %c0_1 = arith.constant 0 : index
    %3 = vector.load %arg2[%c0, %c0_1] : memref<16x32xf32, #tpu.memory_space<vmem>>, vector<16x32xf32>
    %4 = tpu.iota {dimensions = array<i32: 1>} : vector<16x32xi32>
    %cst = arith.constant 0.000000e+00 : f32
    %5 = vector.broadcast %cst : f32 to vector<16x1xf32>
    %cst_2 = arith.constant dense<0xFF800000> : vector<16xf32>
    %6 = vector.multi_reduction <maximumf>, %3, %cst_2 [1] : vector<16x32xf32> to vector<16xf32>
    %7 = vector.shape_cast %6 : vector<16xf32> to vector<16x1xf32>
    %8 = arith.addf %5, %7 : vector<16x1xf32>
    %9 = vector.broadcast %7 : vector<16x1xf32> to vector<16x32xf32>
    %10 = arith.cmpf oeq, %3, %9 : vector<16x32xf32>
    %c32_i32 = arith.constant 32 : i32
    %11 = vector.broadcast %c32_i32 : i32 to vector<16x32xi32>
    %12 = arith.select %10, %4, %11 : vector<16x32xi1>, vector<16x32xi32>
    %cst_3 = arith.constant dense<2147483647> : vector<16xi32>
    %13 = vector.multi_reduction <minsi>, %12, %cst_3 [1] : vector<16x32xi32> to vector<16xi32>
    %14 = vector.shape_cast %13 : vector<16xi32> to vector<16x1xi32>
    %15 = vector.broadcast %14 : vector<16x1xi32> to vector<16x32xi32>
    %16 = arith.cmpi eq, %4, %15 : vector<16x32xi32>
    %cst_4 = arith.constant 0xFF800000 : f32
    %17 = vector.broadcast %cst_4 : f32 to vector<16x32xf32>
    %18 = arith.select %16, %17, %3 : vector<16x32xi1>, vector<16x32xf32>
    %cst_5 = arith.constant dense<0xFF800000> : vector<16xf32>
    %19 = vector.multi_reduction <maximumf>, %18, %cst_5 [1] : vector<16x32xf32> to vector<16xf32>
    %20 = vector.shape_cast %19 : vector<16xf32> to vector<16x1xf32>
    %21 = arith.addf %8, %20 : vector<16x1xf32>
    %22 = vector.broadcast %20 : vector<16x1xf32> to vector<16x32xf32>
    %23 = arith.cmpf oeq, %18, %22 : vector<16x32xf32>
    %c32_i32_6 = arith.constant 32 : i32
    %24 = vector.broadcast %c32_i32_6 : i32 to vector<16x32xi32>
    %25 = arith.select %23, %4, %24 : vector<16x32xi1>, vector<16x32xi32>
    %cst_7 = arith.constant dense<2147483647> : vector<16xi32>
    %26 = vector.multi_reduction <minsi>, %25, %cst_7 [1] : vector<16x32xi32> to vector<16xi32>
    %27 = vector.shape_cast %26 : vector<16xi32> to vector<16x1xi32>
    %28 = vector.broadcast %27 : vector<16x1xi32> to vector<16x32xi32>
    %29 = arith.cmpi eq, %4, %28 : vector<16x32xi32>
    %cst_8 = arith.constant 0xFF800000 : f32
    %30 = vector.broadcast %cst_8 : f32 to vector<16x32xf32>
    %31 = arith.select %29, %30, %18 : vector<16x32xi1>, vector<16x32xf32>
    %cst_9 = arith.constant dense<0xFF800000> : vector<16xf32>
    %32 = vector.multi_reduction <maximumf>, %31, %cst_9 [1] : vector<16x32xf32> to vector<16xf32>
    %33 = vector.shape_cast %32 : vector<16xf32> to vector<16x1xf32>
    %34 = arith.addf %21, %33 : vector<16x1xf32>
    %cst_10 = arith.constant 1.000000e+00 : f32
    %35 = vector.broadcast %cst_10 : f32 to vector<16x1xf32>
    %36 = arith.subf %35, %34 : vector<16x1xf32>
    %37 = arith.mulf %36, %36 : vector<16x1xf32>
    %c1_i32 = arith.constant 1 : i32
    %38 = arith.muli %arg0, %c1_i32 : i32
    %39 = arith.addi %38, %arg1 : i32
    %c16_i32 = arith.constant 16 : i32
    %40 = arith.muli %39, %c16_i32 : i32
    %41 = tpu.iota {dimensions = array<i32: 0>} : vector<16x1xi32>
    %42 = vector.broadcast %40 : i32 to vector<16x1xi32>
    %43 = arith.addi %42, %41 : vector<16x1xi32>
    %c16_i32_11 = arith.constant 16 : i32
    %44 = vector.broadcast %c16_i32_11 : i32 to vector<16x1xi32>
    %45 = arith.cmpi slt, %43, %44 : vector<16x1xi32>
    %cst_12 = arith.constant 0.000000e+00 : f32
    %46 = vector.broadcast %cst_12 : f32 to vector<16x1xf32>
    %47 = arith.select %45, %37, %46 : vector<16x1xi1>, vector<16x1xf32>
    %c0_13 = arith.constant 0 : index
    %c0_14 = arith.constant 0 : index
    %c0_15 = arith.constant 0 : index
    %48 = vector.load %arg3[%c0_13, %c0_14, %c0_15] : memref<1x1x1xf32, #tpu.memory_space<vmem>>, vector<1x1x1xf32>
    %49 = vector.shape_cast %47 : vector<16x1xf32> to vector<1x16x1xf32>
    %cst_16 = arith.constant dense<0.000000e+00> : vector<1xf32>
    %50 = vector.multi_reduction <add>, %49, %cst_16 [1, 2] : vector<1x16x1xf32> to vector<1xf32>
    %51 = vector.shape_cast %50 : vector<1xf32> to vector<1x1x1xf32>
    %52 = vector.extract %51[0, 0, 0] : f32 from vector<1x1x1xf32>
    %53 = vector.broadcast %52 : f32 to vector<1x1x1xf32>
    %54 = arith.addf %48, %53 : vector<1x1x1xf32>
    %c0_17 = arith.constant 0 : index
    %c0_18 = arith.constant 0 : index
    %c0_19 = arith.constant 0 : index
    %55 = vector.load %arg3[%c0_17, %c0_18, %c0_19] : memref<1x1x1xf32, #tpu.memory_space<vmem>>, vector<1x1x1xf32>
    tpu.vector_store %arg3[%c0_17, %c0_18, %c0_19], %54 {strides = array<i32>} : memref<1x1x1xf32, #tpu.memory_space<vmem>>, vector<1x1x1xf32>,
    return
  }
  func.func @transform_0(%arg0: i32, %arg1: i32) -> (i32, i32) {
    %c1_i32 = arith.constant 1 : i32
    %0 = arith.muli %arg0, %c1_i32 : i32
    %1 = arith.addi %0, %arg1 : i32
    %c0_i32 = arith.constant 0 : i32
    %c0_i32_0 = arith.constant 0 : i32
    return %1, %c0_i32 : i32, i32
  }
  func.func @transform_1(%arg0: i32, %arg1: i32) -> (i32, i32, i32) {
    %c0_i32 = arith.constant 0 : i32
    %c0_i32_0 = arith.constant 0 : i32
    %c0_i32_1 = arith.constant 0 : i32
    return %arg0, %c0_i32, %c0_i32_0 : i32, i32, i32
  }
}

</mosaic_0001>

<bundles_post_ra>
// kernel: tpu_custom_call.1
= control target key start
LH: loop header
LB: loop body
LE: loop exit
PB: predicated region body
PF: predicated region fallthrough
CT: control target
= control target key end

     0   :  { %6 = vsyncpa [#allocation3], 0  ;;  %s313_s0 = inlined_call_operand.hbm [shape: f32[16,32], index: 0, kind: input, shape index: {}]   ;;  %s314_s1 = inlined_call_operand.hbm [shape: f32[1,1,1], index: 1, kind: output, shape index: {}]  }
   0x1   :  { %7 = vsyncpa [#allocation4], 0  ;;  %s244_s6 = smov [#allocation2]   ;;  %s196_s10 = scalar_lea.hbm %s313_s0, 256 }
   0x2   :  { %s17_s7 = sshll.u32 %s244_s6, 4  ;;  %p197_p0 = scmp.ne.s32.totalorder %s313_s0, %s196_s10  ;;  %s18_s7 = int_to_ptr.vmem [resolvable:$true] %s17_s7 }
   0x3   :  { %p200_p1 = scmp.lt.u32.totalorder %s196_s10, %s313_s0 }
   0x5   :  { %p202_p2 = pnand %p200_p1, %p197_p0 }
   0x7   :  { %205 = shalt.err (!%p202_p2)
}
   0x8   :  { %s206_s15 = scalar_lea.vmem %s18_s7, 256  ;;  %p211_p4 = scmp.lt.s32.totalorder %s18_s7, %s18_s7 }
   0x9   :  { %p207_p3 = scmp.ne.s32.totalorder %s18_s7, %s206_s15  ;;  %p212_p5 = scmp.lt.s32.totalorder %s206_s15, %s206_s15 }
   0xb   :  { %p213_p6 = por %p212_p5, %p211_p4 }
   0xd   :  { %p214_p7 = pnand %p213_p6, %p207_p3 }
   0xf   :  { %217 = shalt.err (!%p214_p7)
}
  0x10   :  { %s245_s16 = smov 128   ;;  %s246_s17 = smov 8  }
  0x11   :  { %23 = dma.hbm_to_vmem [thread:$0]  %s313_s0, 256, %s18_s7, [#allocation3], %s245_s16, %s245_s16, %s246_s17  }
  0x12   :  { %240 = dma.done.wait [#allocation3], 256  }
  0x13   :  { %241 = vsyncadd [#allocation3], 4294967040  ;;  %vm33_vm0 = vcmask 0   ;;  %v247_v0 = vmov 0.0   ;;  %vm39_vm1 = vcmask 261120   ;;  %v35_v1 = vld [vmem:[#allocation2] sm:$0xff]  ;;  %v37_v5 = vlaneseq }
  0x14   :  { %34 = vst.msk [vmem:[#allocation5] sm:$0x1] %vm33_vm0, %v247_v0  ;;  %v36_v2 = vld [vmem:[#allocation2 + $0x8] sm:$0xff]  ;;  %v40_v3 = vsel %vm39_vm1, %v35_v1, -inf  ;;  %vm157_vm14 = vcmask 7168   ;;  %s248_s0 = smov [#allocation5]  }
  0x15   :  { %41 = vmax.xlane.f32.xlu0 %v40_v3  ;;  %v43_v4 = vsel %vm39_vm1, %v36_v2, -inf  ;;  %v274_v6 = vand.u32 127, %v37_v5  ;;  %s180_s20 = sshll.u32 %s248_s0, 4  ;;  %s181_s20 = int_to_ptr.vmem [resolvable:$true] %s180_s20 }
  0x16   :  { %s218_s22 = scalar_lea.vmem %s181_s20, 16  ;;  %s222_s23 = scalar_lea.vmem %s181_s20, 32 }
  0x17   :  { %p219_p8 = scmp.ne.s32.totalorder %s181_s20, %s218_s22  ;;  %p223_p9 = scmp.lt.s32.totalorder %s181_s20, %s181_s20 }
  0x18   :  { %p224_p10 = scmp.lt.s32.totalorder %s222_s23, %s218_s22 }
  0x19   :  { %44 = vmax.xlane.f32.xlu0 %v43_v4 }
  0x1a   :  { %p225_p11 = por %p224_p10, %p223_p9 }
  0x1c   :  { %p226_p12 = pnand %p225_p11, %p219_p8 }
  0xa2   :  { %v276_v7 = vpop.xlane.xlu0 %41 }
  0xa3   :  { %vm48_vm2 = vcmp.eq.f32.partialorder %v35_v1, %v276_v7 }
  0xa4   :  { %v50_v8 = vsel %vm48_vm2, %v274_v6, 32 }
  0xa5   :  { %v52_v9 = vsel %vm39_vm1, %v50_v8, 2147483647 }
  0xa6   :  { %v281_v10 = vpop.xlane.xlu0 %44  ;;  %v54_v11 = vshra.s32 %v52_v9, 16  ;;  %v53_v17 = vand.u32 65535, %v52_v9 }
  0xa7   :  { %vm49_vm3 = vcmp.eq.f32.partialorder %v36_v2, %v281_v10 }
  0xa8   :  { %v51_v12 = vsel %vm49_vm3, %v274_v6, 32  ;;  %v56_v13 = vcvt.s32.f32 %v54_v11  ;;  %v55_v19 = vcvt.s32.f32 %v53_v17 }
  0xa9   :  { %v67_v14 = vsel %vm39_vm1, %v51_v12, 2147483647 }
  0xaa   :  { %57 = vmin.xlane.f32.xlu1 %v56_v13  ;;  %v69_v15 = vshra.s32 %v67_v14, 16  ;;  %v68_v20 = vand.u32 65535, %v67_v14 }
  0xac   :  { %v71_v16 = vcvt.s32.f32 %v69_v15  ;;  %v70_v23 = vcvt.s32.f32 %v68_v20 }
  0xae   :  { %72 = vmin.xlane.f32.xlu1 %v71_v16 }
 0x137   :  { %v58_v18 = vpop.xlane.xlu1 %57 }
 0x138   :  { %vm59_vm4 = vcmp.eq.f32.partialorder %v56_v13, %v58_v18  ;;  %v64_v25 = vcvt.f32.s32 %v58_v18 }
 0x139   :  { %v60_v21 = vsel %vm59_vm4, %v55_v19, inf }
 0x13a   :  { %61 = vmin.xlane.f32.xlu0 %v60_v21  ;;  %v65_v27 = vshll.u32 %v64_v25, 16 }
 0x13b   :  { %v73_v22 = vpop.xlane.xlu1 %72 }
 0x13c   :  { %vm74_vm5 = vcmp.eq.f32.partialorder %v71_v16, %v73_v22  ;;  %v79_v28 = vcvt.f32.s32 %v73_v22 }
 0x13d   :  { %v75_v24 = vsel %vm74_vm5, %v70_v23, inf }
 0x13e   :  { %76 = vmin.xlane.f32.xlu1 %v75_v24  ;;  %v80_v32 = vshll.u32 %v79_v28, 16 }
 0x1c7   :  { %v62_v26 = vpop.xlane.xlu0 %61 }
 0x1c8   :  { %v63_v29 = vcvt.f32.s32 %v62_v26 }
 0x1ca   :  { %v66_v30 = vadd.s32 %v65_v27, %v63_v29 }
 0x1cb   :  { %v77_v31 = vpop.xlane.xlu1 %76 }
 0x1cc   :  { %v78_v33 = vcvt.f32.s32 %v77_v31  ;;  %vm82_vm6 = vcmp.eq.s32.totalorder %v274_v6, %v66_v30 }
 0x1cd   :  { %v84_v34 = vsel %vm82_vm6, -inf, %v35_v1 }
 0x1ce   :  { %v81_v35 = vadd.s32 %v80_v32, %v78_v33  ;;  %v86_v36 = vsel %vm39_vm1, %v84_v34, -inf }
 0x1cf   :  { %87 = vmax.xlane.f32.xlu0 %v86_v36 }
 0x1d0   :  { %vm83_vm7 = vcmp.eq.s32.totalorder %v274_v6, %v81_v35 }
 0x1d1   :  { %v85_v37 = vsel %vm83_vm7, -inf, %v36_v2 }
 0x1d2   :  { %v89_v38 = vsel %vm39_vm1, %v85_v37, -inf }
 0x1d3   :  { %90 = vmax.xlane.f32.xlu1 %v89_v38 }
 0x25c   :  { %v88_v39 = vpop.xlane.xlu0 %87 }
 0x25d   :  { %vm94_vm8 = vcmp.eq.f32.partialorder %v84_v34, %v88_v39  ;;  %v92_v9 = vadd.f32 %v88_v39, %v276_v7 }
 0x25e   :  { %v96_v40 = vsel %vm94_vm8, %v274_v6, 32 }
 0x25f   :  { %v98_v41 = vsel %vm39_vm1, %v96_v40, 2147483647 }
 0x260   :  { %v91_v42 = vpop.xlane.xlu1 %90  ;;  %v100_v43 = vshra.s32 %v98_v41, 16  ;;  %v99_v49 = vand.u32 65535, %v98_v41 }
 0x261   :  { %vm95_vm9 = vcmp.eq.f32.partialorder %v85_v37, %v91_v42  ;;  %v93_v13 = vadd.f32 %v91_v42, %v281_v10  ;;  %v156_v10 = vld [vmem:[#allocation5] sm:$0x1] }
 0x262   :  { %v97_v44 = vsel %vm95_vm9, %v274_v6, 32  ;;  %v102_v45 = vcvt.s32.f32 %v100_v43  ;;  %v101_v51 = vcvt.s32.f32 %v99_v49 }
 0x263   :  { %v113_v46 = vsel %vm39_vm1, %v97_v44, 2147483647 }
 0x264   :  { %103 = vmin.xlane.f32.xlu0 %v102_v45  ;;  %v115_v47 = vshra.s32 %v113_v46, 16  ;;  %v114_v52 = vand.u32 65535, %v113_v46 }
 0x266   :  { %v117_v48 = vcvt.s32.f32 %v115_v47  ;;  %v116_v55 = vcvt.s32.f32 %v114_v52 }
 0x268   :  { %118 = vmin.xlane.f32.xlu1 %v117_v48 }
 0x2f1   :  { %v104_v50 = vpop.xlane.xlu0 %103 }
 0x2f2   :  { %vm105_vm10 = vcmp.eq.f32.partialorder %v102_v45, %v104_v50  ;;  %v110_v57 = vcvt.f32.s32 %v104_v50 }
 0x2f3   :  { %v106_v53 = vsel %vm105_vm10, %v101_v51, inf }
 0x2f4   :  { %107 = vmin.xlane.f32.xlu0 %v106_v53  ;;  %v111_v59 = vshll.u32 %v110_v57, 16 }
 0x2f5   :  { %v119_v54 = vpop.xlane.xlu1 %118 }
 0x2f6   :  { %vm120_vm11 = vcmp.eq.f32.partialorder %v117_v48, %v119_v54  ;;  %v125_v60 = vcvt.f32.s32 %v119_v54 }
 0x2f7   :  { %v121_v56 = vsel %vm120_vm11, %v116_v55, inf }
 0x2f8   :  { %122 = vmin.xlane.f32.xlu1 %v121_v56  ;;  %v126_v0 = vshll.u32 %v125_v60, 16 }
 0x381   :  { %v108_v58 = vpop.xlane.xlu0 %107 }
 0x382   :  { %v109_v61 = vcvt.f32.s32 %v108_v58 }
 0x384   :  { %v112_v62 = vadd.s32 %v111_v59, %v109_v61 }
 0x385   :  { %v123_v63 = vpop.xlane.xlu1 %122 }
 0x386   :  { %v124_v1 = vcvt.f32.s32 %v123_v63  ;;  %vm128_vm12 = vcmp.eq.s32.totalorder %v274_v6, %v112_v62 }
 0x387   :  { %v130_v2 = vsel %vm128_vm12, -inf, %v84_v34 }
 0x388   :  { %v127_v3 = vadd.s32 %v126_v0, %v124_v1  ;;  %v132_v4 = vsel %vm39_vm1, %v130_v2, -inf }
 0x389   :  { %133 = vmax.xlane.f32.xlu0 %v132_v4 }
 0x38a   :  { %vm129_vm13 = vcmp.eq.s32.totalorder %v274_v6, %v127_v3 }
 0x38b   :  { %v131_v5 = vsel %vm129_vm13, -inf, %v85_v37 }
 0x38c   :  { %v135_v8 = vsel %vm39_vm1, %v131_v5, -inf }
 0x38d   :  { %136 = vmax.xlane.f32.xlu1 %v135_v8 }
 0x416   :  { %v134_v11 = vpop.xlane.xlu0 %133 }
 0x417   :  { %v138_v12 = vadd.f32 %v134_v11, %v92_v9 }
 0x419   :  { %v140_v14 = vsub.f32 1.0, %v138_v12 }
 0x41a   :  { %v137_v15 = vpop.xlane.xlu1 %136 }
 0x41b   :  { %v139_v16 = vadd.f32 %v137_v15, %v93_v13  ;;  %v142_v17 = vmul.f32 %v140_v14, %v140_v14 }
 0x41d   :  { %v141_v18 = vsub.f32 1.0, %v139_v16  ;;  %v158_v20 = vsel %vm157_vm14, %v142_v17, 0.0 }
 0x41f   :  { %v143_v19 = vmul.f32 %v141_v18, %v141_v18 }
 0x421   :  { %v159_v21 = vsel %vm157_vm14, %v143_v19, 0.0 }
 0x422   :  { %v160_v6 = vadd.f32 %v159_v21, %v158_v20 }
 0x424   :  { %161 = vadd.xlane.f32.xlu0 %v160_v6 }
 0x4b1   :  { %v162_v22 = vpop.xlane.xlu0 %161 }
 0x4b2   :  { %v163_v23 = vrot.slane %v162_v22, 4 }
 0x4b4   :  { %v164_v24 = vadd.f32 %v163_v23, %v162_v22 }
 0x4b6   :  { %v165_v25 = vrot.slane %v164_v24, 2 }
 0x4b8   :  { %v166_v7 = vadd.f32 %v165_v25, %v164_v24 }
 0x4ba   :  { %v167_v26 = vrot.slane %v166_v7, 1 }
 0x4bc   :  { %v168_v27 = vadd.f32 %v167_v26, %v166_v7 }
 0x4be   :  { %189 = vpush %v168_v27 }
 0x4ef   :  { %s190_s21 = spop %189 }
 0x4f0   :  { %v170_v28 = vstv %s190_s21 }
 0x4f1   :  { %v171_v29 = vadd.f32 %v170_v28, %v156_v10 }
 0x4f3   :  { %173 = vst.msk [vmem:[#allocation5] sm:$0x1] %vm33_vm0, %v171_v29 }
 0x4f4   :  { %229 = shalt.err (!%p226_p12)
}
 0x4f5   :  { %s230_s26 = scalar_lea.hbm %s314_s1, 16 }
 0x4f6   :  { %p231_p13 = scmp.ne.s32.totalorder %s314_s1, %s230_s26  ;;  %p234_p0 = scmp.lt.u32.totalorder %s230_s26, %s314_s1 }
 0x4f8   :  { %p236_p1 = pnand %p234_p0, %p231_p13 }
 0x4fa   :  { %239 = shalt.err (!%p236_p1)
}
 0x4fb   :  { %183 = dma.vmem_to_hbm [thread:$0]  %s181_s20, 16, %s314_s1, [#allocation4]  }
 0x4fc   :  { %242 = dma.done.wait [#allocation4], 16  }
 0x4fd   :  { %243 = vsyncadd [#allocation4], 4294967280 }
 0x4fe   :  { %187 = vsyncpa [#allocation3], 1 }
 0x4ff   :  { %188 = vsyncpa [#allocation4], 1 }

</bundles_post_ra>
